<compile_context>
chip_gen: v7x
topology: tpu7x:2x2x1
jax: 0.10.0
libtpu: 0.0.40
codegen_flags: <defaults>
</compile_context>

<pallas_src>
import functools

import jax
import jax.numpy as jnp
from jax.experimental import pallas as pl
from jax.experimental.pallas import tpu as pltpu

B, S, H, V = 4, 8, 128, 32          # batch, seq, hidden, vocab (synthetic)
TEMPERATURE = 0.05


# ---------------------------------------------------------------------------
# Single fused kernel: per-token encoder on the 2B pooled tokens,
# L2-normalize, sims / temperature, cross-entropy.
# ---------------------------------------------------------------------------
def _fused_kernel(ids_ref, table_ref,            # inputs
                  sims_ref, loss_ref,            # outputs (VMEM, SMEM)
                  *, b, v, inv_temp):
    n = 2 * b                                                     # 8 pooled tokens

    # ---- synthetic encoder on the pooled tokens only.
    # TODO(synk): the real module runs a 4-bit quantized HF transformer with
    #             LoRA adapters here (position-dependent); pooling-before-
    #             encoding and the embed@W fold are only valid for this
    #             per-token synthetic stand-in.
    ids = ids_ref[...]                                            # [n, 1] i32
    vocab = jax.lax.broadcasted_iota(jnp.int32, (n, v), 1)        # [n, v]
    onehot = (ids == vocab).astype(jnp.bfloat16)                  # [n, v] bf16
    pooled = jnp.tanh(                                            # f32 tanh (EUP)
        jnp.dot(onehot, table_ref[...],                           # bf16 MXU, f32 acc
                preferred_element_type=jnp.float32))              # [n, h] f32

    # ---- F.normalize(p=2, dim=-1)
    ssq = jnp.sum(pooled * pooled, axis=-1, keepdims=True)
    normed = pooled * jax.lax.rsqrt(jnp.maximum(ssq, 1e-24))

    # ---- sims = (q @ p^T) / temperature  (tiny [b,h]x[b,h]; f32 operands)
    q = normed[:b, :]
    p = normed[b:, :]
    sims = jax.lax.dot_general(q, p, (((1,), (1,)), ((), ())),
                               preferred_element_type=jnp.float32) * inv_temp
    sims_ref[...] = sims

    # ---- cross_entropy(sims, labels=arange(b)), mean over rows
    m = jnp.max(sims, axis=-1, keepdims=True)
    lse = m + jnp.log(jnp.sum(jnp.exp(sims - m), axis=-1, keepdims=True))
    r = jax.lax.broadcasted_iota(jnp.int32, (b, b), 0)
    c = jax.lax.broadcasted_iota(jnp.int32, (b, b), 1)
    diag = jnp.sum(jnp.where(r == c, sims, 0.0), axis=-1, keepdims=True)
    loss_ref[0, 0] = jnp.sum(lse - diag) * (1.0 / float(b))       # scalar -> SMEM


def fused_forward(pooled_ids, table):
    return pl.pallas_call(
        functools.partial(_fused_kernel, b=B, v=V,
                          inv_temp=float(1.0 / TEMPERATURE)),
        out_shape=(jax.ShapeDtypeStruct((B, B), jnp.float32),     # sims
                   jax.ShapeDtypeStruct((1, 1), jnp.float32)),    # loss (scalar)
        in_specs=[
            pl.BlockSpec(memory_space=pltpu.MemorySpace.VMEM),    # pooled ids [2B,1]
            pl.BlockSpec(memory_space=pltpu.MemorySpace.VMEM),    # folded table [V,H] bf16
        ],
        out_specs=(pl.BlockSpec(memory_space=pltpu.MemorySpace.VMEM),
                   pl.BlockSpec(memory_space=pltpu.MemorySpace.SMEM)),
        cost_estimate=pl.CostEstimate(flops=75_000,
                                      transcendentals=1_100,
                                      bytes_accessed=8_500),
    )(pooled_ids, table)


# ---------------------------------------------------------------------------
# Model glue
# ---------------------------------------------------------------------------
def init_params(key):
    k1, k2 = jax.random.split(key)
    embed = 0.02 * jax.random.normal(k1, (V, H), jnp.float32)
    w = jax.random.normal(k2, (H, H), jnp.float32) / jnp.sqrt(float(H))
    return {"embed": embed, "w": w}


def _last_token_index(attention_mask):
    # last_token_pool index logic (pure scalar/index prep). Integer arithmetic
    # throughout; `% s` mimics torch's negative-index wrap for an all-zero
    # mask row.
    b, s = attention_mask.shape
    mask = attention_mask.astype(jnp.int32)
    left_pad = jnp.sum(mask[:, -1]) == b
    lengths = jnp.sum(mask, axis=1)
    return jnp.where(left_pad, s - 1, (lengths - 1) % s).astype(jnp.int32)


@jax.jit
def forward_train(params, text_ids, text_mask, mis_ids, mis_mask):
    # Pool before encoding: gather only the 2B last-token ids.
    # TODO(synk): with the real causal-transformer backbone the full sequence
    #             must be encoded before pooling; this shortcut is exact only
    #             for the position-independent synthetic encoder.
    text_idx = _last_token_index(text_mask)                       # [B]
    mis_idx = _last_token_index(mis_mask)                         # [B]
    text_last = jnp.take_along_axis(text_ids.astype(jnp.int32),
                                    text_idx[:, None], axis=1)    # [B,1]
    mis_last = jnp.take_along_axis(mis_ids.astype(jnp.int32),
                                   mis_idx[:, None], axis=1)      # [B,1]
    pooled_ids = jnp.concatenate([text_last, mis_last], axis=0)   # [2B,1] i32

    # Fold embed @ W once (bf16 MXU operands, f32 accumulation), round to bf16:
    # one-hot row selection commutes with the right matmul, so tanh(onehot@table)
    # equals tanh((onehot@embed)@W) up to the bf16 rounding of the folded rows.
    table = jnp.dot(params["embed"].astype(jnp.bfloat16),
                    params["w"].astype(jnp.bfloat16),
                    preferred_element_type=jnp.float32).astype(jnp.bfloat16)

    sims, loss = fused_forward(pooled_ids, table)
    return loss[0, 0], sims


def _reference(params, text_ids, text_mask, mis_ids, mis_mask, match_kernel):
    embed, w = params["embed"], params["w"]
    if match_kernel:  # mirror the kernel's folded bf16 table numerics
        table = jnp.dot(embed.astype(jnp.bfloat16), w.astype(jnp.bfloat16),
                        preferred_element_type=jnp.float32)
        table = table.astype(jnp.bfloat16).astype(jnp.float32)

        def backbone(ids):
            return jnp.tanh(jnp.take(table, ids, axis=0))
    else:             # pure-f32 original ordering: embed lookup, then @ W
        def backbone(ids):
            emb = jnp.take(embed, ids, axis=0)                    # [B,S,H]
            return jnp.tanh(jnp.einsum("bsh,hk->bsk", emb, w))

    def enc(ids, mask):
        hs = backbone(ids)
        left_pad = jnp.sum(mask[:, -1]) == B
        idx = jnp.where(left_pad, S - 1, jnp.sum(mask, axis=1) - 1)
        pooled = hs[jnp.arange(B), idx]
        n = jnp.sqrt(jnp.sum(pooled * pooled, axis=-1, keepdims=True))
        return pooled / jnp.maximum(n, 1e-12)

    q, p = enc(text_ids, text_mask), enc(mis_ids, mis_mask)
    sims = (q @ p.T) / TEMPERATURE
    lse = jax.scipy.special.logsumexp(sims, axis=-1)
    return jnp.mean(lse - jnp.diag(sims))


if __name__ == "__main__":
    key = jax.random.PRNGKey(0)
    kp, k1, k2 = jax.random.split(key, 3)
    params = init_params(kp)

    text_ids = jax.random.randint(k1, (B, S), 0, V, jnp.int32)
    mis_ids = jax.random.randint(k2, (B, S), 0, V, jnp.int32)
    # out-of-range ids would silently map to a zero embedding in-kernel
    assert int(jnp.max(text_ids)) < V and int(jnp.max(mis_ids)) < V
    assert int(jnp.min(text_ids)) >= 0 and int(jnp.min(mis_ids)) >= 0

    # right-padded attention masks (varying lengths) — exercises the
    # sequence_lengths = mask.sum(1) - 1 pooling branch.
    lengths = jnp.array([8, 5, 6, 3], jnp.int32)
    pos = jnp.arange(S, dtype=jnp.int32)[None, :]
    text_mask = (pos < lengths[:, None]).astype(jnp.int32)
    mis_mask = (pos < jnp.array([7, 8, 4, 6], jnp.int32)[:, None]).astype(jnp.int32)

    loss, sims = forward_train(params, text_ids, text_mask, mis_ids, mis_mask)
    jax.block_until_ready((loss, sims))

    # tight check vs. a reference with matching bf16 numerics,
    # loose sanity check vs. the pure-f32 reference (original op ordering).
    ref_bf16 = _reference(params, text_ids, text_mask, mis_ids, mis_mask, True)
    ref_f32 = _reference(params, text_ids, text_mask, mis_ids, mis_mask, False)
    assert jnp.allclose(loss, ref_bf16, rtol=1e-2, atol=1e-2), (loss, ref_bf16)
    assert jnp.allclose(loss, ref_f32, rtol=1e-1, atol=1e-1), (loss, ref_f32)

    print("KERNEL_OK")
</pallas_src>

<mosaic_0001>
module attributes {stable_mosaic.version = 11 : i64} {
  func.func @_fused_kernel(%arg0: memref<8x1xi32, #tpu.memory_space<vmem>>, %arg1: memref<32x128xbf16, #tpu.memory_space<vmem>>, %arg2: memref<4x4xf32, #tpu.memory_space<vmem>>, %arg3: memref<1x1xf32, #tpu.memory_space<smem>>) attributes {dimension_semantics = [], scalar_prefetch = 0 : i64, scratch_operands = 0 : i64, tpu.core_type = #tpu.core_type<tc>} {
    %c0 = arith.constant 0 : index
    %c0_0 = arith.constant 0 : index
    %0 = vector.load %arg0[%c0, %c0_0] : memref<8x1xi32, #tpu.memory_space<vmem>>, vector<8x1xi32>
    %1 = tpu.iota {dimensions = array<i32: 1>} : vector<8x32xi32>
    %2 = vector.broadcast %0 : vector<8x1xi32> to vector<8x32xi32>
    %3 = arith.cmpi eq, %2, %1 : vector<8x32xi32>
    %4 = arith.extui %3 : vector<8x32xi1> to vector<8x32xi32>
    %5 = arith.sitofp %4 : vector<8x32xi32> to vector<8x32xf32>
    %6 = arith.truncf %5 : vector<8x32xf32> to vector<8x32xbf16>
    %c0_1 = arith.constant 0 : index
    %c0_2 = arith.constant 0 : index
    %7 = vector.load %arg1[%c0_1, %c0_2] : memref<32x128xbf16, #tpu.memory_space<vmem>>, vector<32x128xbf16>
    %cst = arith.constant dense<0.000000e+00> : vector<8x128xf32>
    %8 = tpu.matmul %6, %7, %cst {dimension_numbers = #tpu.dot_dimension_numbers<[1], [0], [0], [1], [0, 0, 1, 1], [], []>} : vector<8x32xbf16>, vector<32x128xbf16>, vector<8x128xf32> -> vector<8x128xf32>
    %9 = math.tanh %8 : vector<8x128xf32>
    %10 = arith.mulf %9, %9 : vector<8x128xf32>
    %cst_3 = arith.constant dense<0.000000e+00> : vector<8xf32>
    %11 = vector.multi_reduction <add>, %10, %cst_3 [1] : vector<8x128xf32> to vector<8xf32>
    %12 = vector.shape_cast %11 : vector<8xf32> to vector<8x1xf32>
    %cst_4 = arith.constant 1.000000e-24 : f32
    %13 = vector.broadcast %cst_4 : f32 to vector<8x1xf32>
    %14 = arith.maximumf %12, %13 : vector<8x1xf32>
    %15 = math.rsqrt %14 : vector<8x1xf32>
    %16 = vector.broadcast %15 : vector<8x1xf32> to vector<8x128xf32>
    %17 = arith.mulf %9, %16 : vector<8x128xf32>
    %18 = vector.extract_strided_slice %17 {offsets = [0, 0], sizes = [4, 128], strides = [1, 1]} : vector<8x128xf32> to vector<4x128xf32>
    %19 = vector.extract_strided_slice %17 {offsets = [4, 0], sizes = [4, 128], strides = [1, 1]} : vector<8x128xf32> to vector<4x128xf32>
    %cst_5 = arith.constant dense<0.000000e+00> : vector<4x4xf32>
    %20 = tpu.matmul %18, %19, %cst_5 {dimension_numbers = #tpu.dot_dimension_numbers<[1], [1], [0], [0], [0, 0, 1, 0], [], []>} : vector<4x128xf32>, vector<4x128xf32>, vector<4x4xf32> -> vector<4x4xf32>
    %cst_6 = arith.constant 2.000000e+01 : f32
    %21 = vector.broadcast %cst_6 : f32 to vector<4x4xf32>
    %22 = arith.mulf %20, %21 : vector<4x4xf32>
    %c0_7 = arith.constant 0 : index
    %c0_8 = arith.constant 0 : index
    %23 = vector.load %arg2[%c0_7, %c0_8] : memref<4x4xf32, #tpu.memory_space<vmem>>, vector<4x4xf32>
    tpu.vector_store %arg2[%c0_7, %c0_8], %22 {strides = array<i32>} : memref<4x4xf32, #tpu.memory_space<vmem>>, vector<4x4xf32>,
    %cst_9 = arith.constant dense<0xFF800000> : vector<4xf32>
    %24 = vector.multi_reduction <maximumf>, %22, %cst_9 [1] : vector<4x4xf32> to vector<4xf32>
    %25 = vector.shape_cast %24 : vector<4xf32> to vector<4x1xf32>
    %26 = vector.broadcast %25 : vector<4x1xf32> to vector<4x4xf32>
    %27 = arith.subf %22, %26 : vector<4x4xf32>
    %28 = math.exp %27 : vector<4x4xf32>
    %cst_10 = arith.constant dense<0.000000e+00> : vector<4xf32>
    %29 = vector.multi_reduction <add>, %28, %cst_10 [1] : vector<4x4xf32> to vector<4xf32>
    %30 = vector.shape_cast %29 : vector<4xf32> to vector<4x1xf32>
    %31 = math.log %30 : vector<4x1xf32>
    %32 = arith.addf %25, %31 : vector<4x1xf32>
    %33 = tpu.iota {dimensions = array<i32: 0>} : vector<4x4xi32>
    %34 = tpu.iota {dimensions = array<i32: 1>} : vector<4x4xi32>
    %35 = arith.cmpi eq, %33, %34 : vector<4x4xi32>
    %cst_11 = arith.constant 0.000000e+00 : f32
    %36 = vector.broadcast %cst_11 : f32 to vector<4x4xf32>
    %37 = arith.select %35, %22, %36 : vector<4x4xi1>, vector<4x4xf32>
    %cst_12 = arith.constant dense<0.000000e+00> : vector<4xf32>
    %38 = vector.multi_reduction <add>, %37, %cst_12 [1] : vector<4x4xf32> to vector<4xf32>
    %39 = vector.shape_cast %38 : vector<4xf32> to vector<4x1xf32>
    %40 = arith.subf %32, %39 : vector<4x1xf32>
    %41 = vector.shape_cast %40 : vector<4x1xf32> to vector<1x4x1xf32>
    %cst_13 = arith.constant dense<0.000000e+00> : vector<1xf32>
    %42 = vector.multi_reduction <add>, %41, %cst_13 [1, 2] : vector<1x4x1xf32> to vector<1xf32>
    %43 = vector.shape_cast %42 : vector<1xf32> to vector<1x1x1xf32>
    %44 = vector.extract %43[0, 0, 0] : f32 from vector<1x1x1xf32>
    %cst_14 = arith.constant 2.500000e-01 : f32
    %45 = arith.mulf %44, %cst_14 : f32
    %c0_15 = arith.constant 0 : index
    %c0_16 = arith.constant 0 : index
    %46 = memref.load %arg3[%c0_15, %c0_16] : memref<1x1xf32, #tpu.memory_space<smem>>
    memref.store %45, %arg3[%c0_15, %c0_16] : memref<1x1xf32, #tpu.memory_space<smem>>
    return
  }
}

</mosaic_0001>

<bundles_post_ra>
// kernel: forward_train.1
= control target key start
LH: loop header
LB: loop body
LE: loop exit
PB: predicated region body
PF: predicated region fallthrough
CT: control target
= control target key end

     0   :  { %9 = vsyncpa [#allocation3], 0  ;;  %v306_v2 = vmov 0   ;;  %v307_v3 = vmov 0.0   ;;  %s368_s0 = inlined_call_operand.vmem [shape: s32[8,1], index: 0, kind: input, shape index: {}]   ;;  %s369_s1 = inlined_call_operand.vmem [shape: bf16[32,128], index: 1, kind: input, shape index: {}]   ;;  %s370_s2 = inlined_call_operand.hbm [shape: f32[4,4], index: 2, kind: output, shape index: {0}]   ;;  %s371_s3 = inlined_call_operand.hbm [shape: f32[1,1], index: 3, kind: output, shape index: {1}]  }
   0x1   :  { %v16_v0 = vld [vmem:[%s368_s0] sm:$0xff]  ;;  %259 = vset.pattern.permute.xlu0 %v306_v2  ;;  %239 = vmatprep.subr.bf16.mxu0 %v307_v3  ;;  %v261_v4 = vld [vmem:[%s369_s1 + $0x8] sm:$0xff]  }
   0x2   :  { %v260_v1 = vld [vmem:[%s369_s1] sm:$0xff]   ;;  %20 = vperm.xlu0 %259, %v16_v0  }
   0x3   :  { %240 = vmatpush3.bf16.msra.mxu0 %v260_v1 }
   0x4   :  { %10 = vsyncpa [#allocation4], 0  ;;  %241 = vmatprep.subr.bf16.mxu0 %v307_v3  ;;  %247 = vmatprep.subr.mxu1 %v307_v3  ;;  %vm308_vm0 = vmmov 0   ;;  %v17_v5 = vlaneseq  ;;  %vm42_vm2 = vcmask 261120   ;;  %vm167_vm3 = vcmask 27648   ;;  %s309_s0 = smov [#allocation2]  }
   0x5   :  { %243 = vmatprep.mubr.msk.bf16.mxu0 %vm308_vm0, %v307_v3  ;;  %249 = vmatprep.mubr.msk.f32.mxu1 %vm308_vm0, %v307_v3  ;;  %vm189_vm5 = vcmask 3072   ;;  %s209_s1 = sshll.u32 %s309_s0, 4  ;;  %s210_s1 = int_to_ptr.vmem [resolvable:$true] %s209_s1 }
   0x6   :  { %v18_v6 = vand.u32 127, %v17_v5  ;;  %v182_v28 = vshrl.u32 %v17_v5, 7  ;;  %s270_s18 = scalar_lea.vmem %s210_s1, 64  ;;  %p275_p1 = scmp.lt.s32.totalorder %s210_s1, %s210_s1 }
   0x7   :  { %242 = vmatpush3.bf16.msra.mxu0 %v261_v4  ;;  %p271_p0 = scmp.ne.s32.totalorder %s210_s1, %s270_s18  ;;  %p276_p2 = scmp.lt.s32.totalorder %s270_s18, %s270_s18 }
   0x8   :  { %vm183_vm4 = vcmp.eq.s32.totalorder %v182_v28, %v18_v6 }
   0x9   :  { %p277_p3 = por %p276_p2, %p275_p1 }
   0xb   :  { %p278_p4 = pnand %p277_p3, %p271_p0 }
  0x81   :  { %v21_v7 = vpop.permute.xlu0 %20 }
  0x82   :  { %vm22_vm1 = vcmp.eq.s32.totalorder %v21_v7, %v18_v6 }
  0x83   :  { %v230_v8 = vsel %vm22_vm1, 1.0, %v307_v3 }
  0x84   :  { %v25_v9 = vpack.c.bf16 %v230_v8, %v230_v8 }
  0x86   :  { %244 = vmatmul.mubr.msk.bf16.vlgmr.msra.gmra.mrb[0].mxu0 %vm42_vm2, %v25_v9 }
 0x159   :  { %v80_v10 = vpop.f32.mrb[0].mxu0 }
 0x15a   :  { %262 = vtanh.f32 %v80_v10  ;;  %v245_v11 = vpop.f32.mrb[1].mxu0 }
 0x15b   :  { %v83_v12 = vpop.f32.mrb[2].mxu0 }
 0x15c   :  { %v246_v13 = vpop.f32.mrb[3].mxu0 }
 0x164   :  { %v263_v14 = vpop.eup %262 }
 0x165   :  { %v87_v15 = vmul.f32 %v263_v14, %v263_v14 }
 0x167   :  { %88 = vadd.xlane.f32.xlu0 %v87_v15 }
 0x1f4   :  { %v89_v16 = vpop.xlane.xlu0 %88 }
 0x1f5   :  { %v90_v17 = vmax.f32 %v89_v16, 1e-24 }
 0x1f7   :  { %264 = vrsqrt.f32 %v90_v17 }
 0x201   :  { %v265_v18 = vpop.eup %264 }
 0x202   :  { %v92_v19 = vmul.f32 %v265_v18, %v263_v14 }
 0x204   :  { %v94_v20 = vrot.slane %v92_v19, 4 }
 0x206   :  { %248 = vmatpush3.xpose.msra.mxu1 %v94_v20 }
 0x209   :  { %250 = vmatmul.mubr.f32.vlgmr.msra.gmra.mrb[0].mxu1 %v92_v19 }
 0x2dc   :  { %v162_v21 = vpop.f32.mrb[0].mxu1 }
 0x2dd   :  { %v166_v22 = vmul.f32 20.0, %v162_v21  ;;  %v251_v23 = vpop.f32.mrb[1].mxu1 }
 0x2df   :  { %v169_v24 = vsel %vm167_vm3, %v166_v22, -inf  ;;  %168 = vst.msk [vmem:[#allocation2] sm:$0xf] %vm167_vm3, %v166_v22  ;;  %v184_v31 = vsel %vm183_vm4, %v166_v22, 0.0 }
 0x2e0   :  { %170 = vmax.xlane.f32.xlu1 %v169_v24  ;;  %v185_v32 = vsel %vm167_vm3, %v184_v31, 0.0 }
 0x36d   :  { %v171_v25 = vpop.xlane.xlu1 %170 }
 0x36e   :  { %v172_v26 = vsub.f32 %v166_v22, %v171_v25 }
 0x370   :  { %v173_v27 = vmul.f32 1.442695, %v172_v26 }
 0x372   :  { %266 = vpow2.f32 %v173_v27 }
 0x37c   :  { %v267_v29 = vpop.eup %266 }
 0x37d   :  { %v175_v30 = vsel %vm167_vm3, %v267_v29, 0.0 }
 0x37e   :  { %176 = vadd.xlane.f32.xlu1 %v175_v30 }
 0x382   :  { %186 = vadd.xlane.f32.xlu1 %v185_v32 }
 0x40b   :  { %v177_v33 = vpop.xlane.xlu1 %176 }
 0x40c   :  { %268 = vlog2.f32 %v177_v33 }
 0x40f   :  { %v187_v37 = vpop.xlane.xlu1 %186 }
 0x416   :  { %v269_v34 = vpop.eup %268 }
 0x417   :  { %v179_v35 = vmul.f32 0.6931472, %v269_v34 }
 0x419   :  { %v180_v36 = vadd.f32 %v179_v35, %v171_v25 }
 0x41b   :  { %v188_v38 = vsub.f32 %v180_v36, %v187_v37 }
 0x41d   :  { %v190_v39 = vsel %vm189_vm5, %v188_v38, 0.0 }
 0x41e   :  { %191 = vadd.xlane.f32.xlu1 %v190_v39 }
 0x41f   :  { %281 = shalt.err (!%p278_p4)
}
 0x420   :  { %s282_s21 = scalar_lea.hbm %s370_s2, 64 }
 0x421   :  { %p283_p5 = scmp.ne.s32.totalorder %s370_s2, %s282_s21  ;;  %p286_p6 = scmp.lt.u32.totalorder %s282_s21, %s370_s2 }
 0x423   :  { %p288_p7 = pnand %p286_p6, %p283_p5 }
 0x425   :  { %291 = shalt.err (!%p288_p7)
}
 0x426   :  { %212 = dma.vmem_to_hbm [thread:$0]  %s210_s1, 64, %s370_s2, [#allocation3]  }
 0x427   :  { %s292_s5 = scalar_lea.hbm %s371_s3, 16 }
 0x428   :  { %p293_p8 = scmp.ne.s32.totalorder %s371_s3, %s292_s5  ;;  %p296_p9 = scmp.lt.u32.totalorder %s292_s5, %s371_s3 }
 0x42a   :  { %p298_p10 = pnand %p296_p9, %p293_p8 }
 0x4ab   :  { %v192_v40 = vpop.xlane.xlu1 %191 }
 0x4ac   :  { %v193_v41 = vrot.slane %v192_v40, 4 }
 0x4ae   :  { %v194_v42 = vadd.f32 %v193_v41, %v192_v40 }
 0x4b0   :  { %v195_v43 = vrot.slane %v194_v42, 2 }
 0x4b2   :  { %v196_v44 = vadd.f32 %v195_v43, %v194_v42 }
 0x4b4   :  { %v197_v45 = vrot.slane %v196_v44, 1 }
 0x4b6   :  { %v198_v46 = vadd.f32 %v197_v45, %v196_v44 }
 0x4b8   :  { %252 = vpush %v198_v46 }
 0x4e9   :  { %s253_s28 = spop %252 }
 0x4ea   :  { %s200_s29 = smul.f32 0.25, %s253_s28 }
 0x4ec   :  { %202 = sst [smem:[#allocation5]] %s200_s29 }
 0x4ed   :  { %301 = shalt.err (!%p298_p10)
}
 0x4ee   :  { %s310_s9 = smov [#allocation5]  }
 0x4ef   :  { %220 = dma.smem_to_hbm %s310_s9, 16, %s371_s3, [#allocation4]  }
 0x4f0   :  { %302 = dma.done.wait [#allocation3], 64  }
 0x4f1   :  { %303 = vsyncadd [#allocation3], 4294967232 }
 0x4f2   :  { %304 = dma.done.wait [#allocation4], 16  }
 0x4f3   :  { %305 = vsyncadd [#allocation4], 4294967280 }
 0x4f4   :  { %227 = sfence }
 0x4f5   :  { %228 = vsyncpa [#allocation3], 1 }
 0x4f6   :  { %229 = vsyncpa [#allocation4], 1 }

</bundles_post_ra>
